<compile_context>
chip_gen: v7x
topology: tpu7x:2x2x1
jax: 0.10.0
libtpu: 0.0.40
codegen_flags: <defaults>
</compile_context>

<pallas_src>
import math
import jax
import jax.numpy as jnp
from jax.experimental import pallas as pl
from jax.experimental.pallas import tpu as pltpu

# ---------------- model dims (small, TPU-tile friendly) ----------------
B = 2      # number of items in batch['text']
S = 8      # sequence length per item
D = 32     # hidden size
DFF = 128  # MLP hidden
V = 128    # vocab size (lane-aligned)
BS = B * S

# rows (within the aux block of the misc slab) of packed small parameters
_G1, _B1, _G2, _B2, _GF, _BF, _BM2, _BM1 = range(8)
_AUX0 = 2 * BS            # first aux row inside the misc slab
MISC_ROWS = 2 * BS + 8    # 40 rows, multiple of 8


# ---------------------------- Pallas kernel ----------------------------
def qa_batch_kernel(
    x_ref,       # (BS, D)            f32  stacked token embeddings
    misc_ref,    # (MISC_ROWS, 128)   f32  bias | onehot*mask | aux params
    wsm_ref,     # (4, D, D)          bf16 wq, wk, wv, wo
    wwd_ref,     # (2, D, 128)        bf16 w1, wvoc
    w2_ref,      # (DFF, D)           bf16
    logits_ref,  # (BS, V)            f32  out
    loss_ref,    # (8, 128)           f32  out: mean loss broadcast (read [0,0])
):
    f32 = jnp.float32
    bf16 = jnp.bfloat16

    bias = misc_ref[0:BS, 0:BS]                 # (BS, BS) additive attn bias
    onehot_m = misc_ref[BS:2 * BS, :]           # (BS, V)  onehot(labels)*mask
    aux = misc_ref[_AUX0:_AUX0 + 8, :]          # (8, 128) packed params

    g1, b1 = aux[_G1:_G1 + 1, :D], aux[_B1:_B1 + 1, :D]
    g2, b2 = aux[_G2:_G2 + 1, :D], aux[_B2:_B2 + 1, :D]
    gf, bff = aux[_GF:_GF + 1, :D], aux[_BF:_BF + 1, :D]
    bm2 = aux[_BM2:_BM2 + 1, :D]
    bm1 = aux[_BM1:_BM1 + 1, :DFF]

    def layer_norm(x, g, b):
        # two-pass variance (matches reference; avoids cancellation)
        mu = jnp.mean(x, axis=-1, keepdims=True)
        d = x - mu
        var = jnp.mean(d * d, axis=-1, keepdims=True)
        return d * jax.lax.rsqrt(var + 1e-5) * g + b

    x = x_ref[...].astype(f32)                                      # (BS, D)

    # ---- self-attention (single head, pre-LN), batch folded ----
    xn = layer_norm(x, g1, b1).astype(bf16)
    q = jnp.dot(xn, wsm_ref[0], preferred_element_type=f32)         # (BS, D)
    k = jnp.dot(xn, wsm_ref[1], preferred_element_type=f32)
    v = jnp.dot(xn, wsm_ref[2], preferred_element_type=f32)
    # contract the shared last dim (q @ k^T) with bf16 operands
    scores = jax.lax.dot_general(
        q.astype(bf16), k.astype(bf16), (((1,), (1,)), ((), ())),
        preferred_element_type=f32) * (1.0 / math.sqrt(D))          # (BS, BS)
    scores = scores + bias                                          # block-diag + pad mask
    m = jnp.max(scores, axis=-1, keepdims=True)
    e = jnp.exp(scores - m)
    probs = e * pl.reciprocal(jnp.sum(e, axis=-1, keepdims=True), approx=True)
    attn = jnp.dot(probs.astype(bf16), v.astype(bf16),
                   preferred_element_type=f32)                      # (BS, D)
    x = x + jnp.dot(attn.astype(bf16), wsm_ref[3], preferred_element_type=f32)

    # ---- MLP (pre-LN) ----
    xn2 = layer_norm(x, g2, b2).astype(bf16)
    h = jax.nn.gelu(jnp.dot(xn2, wwd_ref[0], preferred_element_type=f32) + bm1)
    x = x + jnp.dot(h.astype(bf16), w2_ref[...], preferred_element_type=f32) + bm2

    # ---- LM head ----
    xf = layer_norm(x, gf, bff).astype(bf16)
    logits = jnp.dot(xf, wwd_ref[1], preferred_element_type=f32)    # (BS, V)
    logits_ref[...] = logits

    # ---- token cross-entropy, per-item masked mean, mean over items ----
    mx = jnp.max(logits, axis=-1, keepdims=True)
    lse = mx + jnp.log(jnp.sum(jnp.exp(logits - mx), axis=-1, keepdims=True))
    picked_m = jnp.sum(onehot_m * logits, axis=-1, keepdims=True)   # mask*logit[label]
    loss_mask = jnp.sum(onehot_m, axis=-1, keepdims=True)           # (BS, 1)
    nll = lse * loss_mask - picked_m                                # (BS, 1)

    # per-item sums via sublane-slice reductions (no tiny MXU pushes)
    per_item = []
    for i in range(B):
        n_i = jnp.sum(nll[i * S:(i + 1) * S], axis=0, keepdims=True)        # (1,1)
        c_i = jnp.sum(loss_mask[i * S:(i + 1) * S], axis=0, keepdims=True)  # (1,1)
        per_item.append(n_i / jnp.maximum(c_i, 1.0))
    mean_loss = sum(per_item) * (1.0 / B)                           # (1,1)
    # lane-dense output tile (unmasked store); wrapper reads [0, 0]
    loss_ref[...] = jnp.broadcast_to(mean_loss, (8, 128))


# ------------------------------ wrapper --------------------------------
def qa_forward_pallas(x_emb, attention_mask, labels, p):
    """x_emb: (B,S,D) f32; attention_mask: (B,S) f32 (1=valid); labels: (B,S) i32."""
    f32 = jnp.float32
    bf16 = jnp.bfloat16
    x_flat = x_emb.reshape(BS, D).astype(f32)

    # block-diagonal (per-item) attention + padded-key masking, additive -1e9
    item_idx = jnp.arange(BS, dtype=jnp.int32) // S
    key_valid = attention_mask.reshape(BS) > 0.5
    bias = jnp.where(
        (item_idx[:, None] == item_idx[None, :]) & key_valid[None, :], 0.0, -1e9
    ).astype(f32)                                                   # (BS, BS)

    onehot_m = (jax.nn.one_hot(labels.reshape(BS), V, dtype=f32)
                * attention_mask.reshape(BS, 1).astype(f32))        # (BS, V)

    # single misc slab: bias | onehot*mask | packed LN/MLP params
    misc = jnp.zeros((MISC_ROWS, 128), f32)
    misc = misc.at[0:BS, 0:BS].set(bias)
    misc = misc.at[BS:2 * BS, :V].set(onehot_m)
    misc = misc.at[_AUX0 + _G1, :D].set(p["g1"][0]).at[_AUX0 + _B1, :D].set(p["b1"][0])
    misc = misc.at[_AUX0 + _G2, :D].set(p["g2"][0]).at[_AUX0 + _B2, :D].set(p["b2"][0])
    misc = misc.at[_AUX0 + _GF, :D].set(p["gf"][0]).at[_AUX0 + _BF, :D].set(p["bf"][0])
    misc = misc.at[_AUX0 + _BM2, :D].set(p["bm2"][0])
    misc = misc.at[_AUX0 + _BM1, :DFF].set(p["bm1"][0])

    # weight packing: same-shape stacks, bf16 MXU operands (f32 accumulate)
    w_small = jnp.stack([p["wq"], p["wk"], p["wv"], p["wo"]], axis=0).astype(bf16)
    w_wide = jnp.stack([p["w1"], p["wvoc"]], axis=0).astype(bf16)   # DFF == V == 128
    w2 = p["w2"].astype(bf16)

    vmem = pltpu.MemorySpace.VMEM
    logits_flat, loss_tile = pl.pallas_call(
        qa_batch_kernel,
        in_specs=[pl.BlockSpec(memory_space=vmem)] * 5,
        out_specs=(pl.BlockSpec(memory_space=vmem),
                   pl.BlockSpec(memory_space=vmem)),
        out_shape=(jax.ShapeDtypeStruct((BS, V), f32),
                   jax.ShapeDtypeStruct((8, 128), f32)),
    )(x_flat, misc, w_small, w_wide, w2)

    # mean over items already taken in-kernel (== torch.stack(losses).mean())
    return logits_flat.reshape(B, S, V), loss_tile[0, 0]


# --------------------------- pure-JAX reference ---------------------------
def qa_forward_ref(x_emb, attention_mask, labels, p):
    def one(x, am, lab):
        def ln(x, g, b):
            mu = jnp.mean(x, -1, keepdims=True)
            var = jnp.mean((x - mu) ** 2, -1, keepdims=True)
            return (x - mu) * jax.lax.rsqrt(var + 1e-5) * g + b

        mr = am[None, :]                      # (1, S)
        mc = am[:, None]                      # (S, 1)
        xn = ln(x, p["g1"], p["b1"])
        q, k, v = xn @ p["wq"], xn @ p["wk"], xn @ p["wv"]
        sc = (q @ k.T) / math.sqrt(D) + (mr - 1.0) * 1e9
        x = x + (jax.nn.softmax(sc, -1) @ v) @ p["wo"]
        xn2 = ln(x, p["g2"], p["b2"])
        x = x + jax.nn.gelu(xn2 @ p["w1"] + p["bm1"]) @ p["w2"] + p["bm2"]
        logits = ln(x, p["gf"], p["bf"]) @ p["wvoc"]
        logp = jax.nn.log_softmax(logits, -1)
        onehot = jax.nn.one_hot(lab, V, dtype=jnp.float32)
        nll = -jnp.sum(onehot * logp, -1, keepdims=True)
        loss = jnp.sum(nll * mc) / jnp.maximum(jnp.sum(mc), 1.0)
        return logits, loss

    logits, losses = jax.vmap(one)(x_emb, attention_mask, labels)
    return logits, jnp.mean(losses)


# ------------------------------- params ----------------------------------
def make_params(key):
    ks = jax.random.split(key, 8)
    s = 0.02
    p = {
        "emb": jax.random.normal(ks[0], (V, D), jnp.float32) * s,
        "wq": jax.random.normal(ks[1], (D, D), jnp.float32) * s,
        "wk": jax.random.normal(ks[2], (D, D), jnp.float32) * s,
        "wv": jax.random.normal(ks[3], (D, D), jnp.float32) * s,
        "wo": jax.random.normal(ks[4], (D, D), jnp.float32) * s,
        "w1": jax.random.normal(ks[5], (D, DFF), jnp.float32) * s,
        "w2": jax.random.normal(ks[6], (DFF, D), jnp.float32) * s,
        "wvoc": jax.random.normal(ks[7], (D, V), jnp.float32) * s,
        "bm1": jnp.zeros((1, DFF), jnp.float32),
        "bm2": jnp.zeros((1, D), jnp.float32),
        "g1": jnp.ones((1, D), jnp.float32), "b1": jnp.zeros((1, D), jnp.float32),
        "g2": jnp.ones((1, D), jnp.float32), "b2": jnp.zeros((1, D), jnp.float32),
        "gf": jnp.ones((1, D), jnp.float32), "bf": jnp.zeros((1, D), jnp.float32),
    }
    return p


if __name__ == "__main__":
    key = jax.random.PRNGKey(0)
    k_par, k_ids, k_lab = jax.random.split(key, 3)
    params = make_params(k_par)

    # batch['text'] -> B items, each {input_ids, attention_mask, labels}
    input_ids = jax.random.randint(k_ids, (B, S), 0, V, dtype=jnp.int32)
    labels = jax.random.randint(k_lab, (B, S), 0, V, dtype=jnp.int32)
    attention_mask = jnp.ones((B, S), jnp.float32)
    attention_mask = attention_mask.at[1, -2:].set(0.0)  # pad tail of item 1

    # glue: embedding gather (outside the hot path)
    x_emb = params["emb"][input_ids]                     # (B, S, D)

    logits, loss = qa_forward_pallas(x_emb, attention_mask, labels, params)
    jax.block_until_ready((logits, loss))

    ref_logits, ref_loss = qa_forward_ref(x_emb, attention_mask, labels, params)
    assert logits.shape == (B, S, V)
    assert jnp.allclose(logits, ref_logits, atol=1e-2, rtol=1e-2)
    assert jnp.allclose(loss, ref_loss, atol=1e-2, rtol=1e-2)
    assert bool(jnp.isfinite(loss))

    print("KERNEL_OK")
</pallas_src>

<mosaic_0001>
module attributes {stable_mosaic.version = 11 : i64} {
  func.func @qa_batch_kernel(%arg0: memref<16x32xf32, #tpu.memory_space<vmem>>, %arg1: memref<40x128xf32, #tpu.memory_space<vmem>>, %arg2: memref<4x32x32xbf16, #tpu.memory_space<vmem>>, %arg3: memref<2x32x128xbf16, #tpu.memory_space<vmem>>, %arg4: memref<128x32xbf16, #tpu.memory_space<vmem>>, %arg5: memref<16x128xf32, #tpu.memory_space<vmem>>, %arg6: memref<8x128xf32, #tpu.memory_space<vmem>>) attributes {dimension_semantics = [], scalar_prefetch = 0 : i64, scratch_operands = 0 : i64, tpu.core_type = #tpu.core_type<tc>} {
    %c0 = arith.constant 0 : index
    %c0_0 = arith.constant 0 : index
    %0 = vector.load %arg1[%c0, %c0_0] : memref<40x128xf32, #tpu.memory_space<vmem>>, vector<16x16xf32>
    %c16 = arith.constant 16 : index
    %c0_1 = arith.constant 0 : index
    %1 = vector.load %arg1[%c16, %c0_1] : memref<40x128xf32, #tpu.memory_space<vmem>>, vector<16x128xf32>
    %c32 = arith.constant 32 : index
    %c0_2 = arith.constant 0 : index
    %2 = vector.load %arg1[%c32, %c0_2] : memref<40x128xf32, #tpu.memory_space<vmem>>, vector<8x128xf32>
    %3 = vector.extract_strided_slice %2 {offsets = [0, 0], sizes = [1, 32], strides = [1, 1]} : vector<8x128xf32> to vector<1x32xf32>
    %4 = vector.extract_strided_slice %2 {offsets = [1, 0], sizes = [1, 32], strides = [1, 1]} : vector<8x128xf32> to vector<1x32xf32>
    %5 = vector.extract_strided_slice %2 {offsets = [2, 0], sizes = [1, 32], strides = [1, 1]} : vector<8x128xf32> to vector<1x32xf32>
    %6 = vector.extract_strided_slice %2 {offsets = [3, 0], sizes = [1, 32], strides = [1, 1]} : vector<8x128xf32> to vector<1x32xf32>
    %7 = vector.extract_strided_slice %2 {offsets = [4, 0], sizes = [1, 32], strides = [1, 1]} : vector<8x128xf32> to vector<1x32xf32>
    %8 = vector.extract_strided_slice %2 {offsets = [5, 0], sizes = [1, 32], strides = [1, 1]} : vector<8x128xf32> to vector<1x32xf32>
    %9 = vector.extract_strided_slice %2 {offsets = [6, 0], sizes = [1, 32], strides = [1, 1]} : vector<8x128xf32> to vector<1x32xf32>
    %10 = vector.extract_strided_slice %2 {offsets = [7, 0], sizes = [1, 128], strides = [1, 1]} : vector<8x128xf32> to vector<1x128xf32>
    %c0_3 = arith.constant 0 : index
    %c0_4 = arith.constant 0 : index
    %11 = vector.load %arg0[%c0_3, %c0_4] : memref<16x32xf32, #tpu.memory_space<vmem>>, vector<16x32xf32>
    %cst = arith.constant dense<0.000000e+00> : vector<16xf32>
    %12 = vector.multi_reduction <add>, %11, %cst [1] : vector<16x32xf32> to vector<16xf32>
    %13 = vector.shape_cast %12 : vector<16xf32> to vector<16x1xf32>
    %cst_5 = arith.constant 3.200000e+01 : f32
    %14 = vector.broadcast %cst_5 : f32 to vector<16x1xf32>
    %15 = arith.divf %13, %14 : vector<16x1xf32>
    %16 = vector.broadcast %15 : vector<16x1xf32> to vector<16x32xf32>
    %17 = arith.subf %11, %16 : vector<16x32xf32>
    %18 = arith.mulf %17, %17 : vector<16x32xf32>
    %cst_6 = arith.constant dense<0.000000e+00> : vector<16xf32>
    %19 = vector.multi_reduction <add>, %18, %cst_6 [1] : vector<16x32xf32> to vector<16xf32>
    %20 = vector.shape_cast %19 : vector<16xf32> to vector<16x1xf32>
    %cst_7 = arith.constant 3.200000e+01 : f32
    %21 = vector.broadcast %cst_7 : f32 to vector<16x1xf32>
    %22 = arith.divf %20, %21 : vector<16x1xf32>
    %cst_8 = arith.constant 9.99999974E-6 : f32
    %23 = vector.broadcast %cst_8 : f32 to vector<16x1xf32>
    %24 = arith.addf %22, %23 : vector<16x1xf32>
    %25 = math.rsqrt %24 : vector<16x1xf32>
    %26 = vector.broadcast %25 : vector<16x1xf32> to vector<16x32xf32>
    %27 = arith.mulf %17, %26 : vector<16x32xf32>
    %28 = vector.broadcast %3 : vector<1x32xf32> to vector<16x32xf32>
    %29 = arith.mulf %27, %28 : vector<16x32xf32>
    %30 = vector.broadcast %4 : vector<1x32xf32> to vector<16x32xf32>
    %31 = arith.addf %29, %30 : vector<16x32xf32>
    %32 = arith.truncf %31 : vector<16x32xf32> to vector<16x32xbf16>
    %c0_9 = arith.constant 0 : index
    %c0_10 = arith.constant 0 : index
    %c0_11 = arith.constant 0 : index
    %33 = vector.load %arg2[%c0_9, %c0_10, %c0_11] : memref<4x32x32xbf16, #tpu.memory_space<vmem>>, vector<1x32x32xbf16>
    %34 = vector.shape_cast %33 : vector<1x32x32xbf16> to vector<32x32xbf16>
    %cst_12 = arith.constant dense<0.000000e+00> : vector<16x32xf32>
    %35 = tpu.matmul %32, %34, %cst_12 {dimension_numbers = #tpu.dot_dimension_numbers<[1], [0], [0], [1], [0, 0, 1, 1], [], []>} : vector<16x32xbf16>, vector<32x32xbf16>, vector<16x32xf32> -> vector<16x32xf32>
    %c1 = arith.constant 1 : index
    %c0_13 = arith.constant 0 : index
    %c0_14 = arith.constant 0 : index
    %36 = vector.load %arg2[%c1, %c0_13, %c0_14] : memref<4x32x32xbf16, #tpu.memory_space<vmem>>, vector<1x32x32xbf16>
    %37 = vector.shape_cast %36 : vector<1x32x32xbf16> to vector<32x32xbf16>
    %cst_15 = arith.constant dense<0.000000e+00> : vector<16x32xf32>
    %38 = tpu.matmul %32, %37, %cst_15 {dimension_numbers = #tpu.dot_dimension_numbers<[1], [0], [0], [1], [0, 0, 1, 1], [], []>} : vector<16x32xbf16>, vector<32x32xbf16>, vector<16x32xf32> -> vector<16x32xf32>
    %c2 = arith.constant 2 : index
    %c0_16 = arith.constant 0 : index
    %c0_17 = arith.constant 0 : index
    %39 = vector.load %arg2[%c2, %c0_16, %c0_17] : memref<4x32x32xbf16, #tpu.memory_space<vmem>>, vector<1x32x32xbf16>
    %40 = vector.shape_cast %39 : vector<1x32x32xbf16> to vector<32x32xbf16>
    %cst_18 = arith.constant dense<0.000000e+00> : vector<16x32xf32>
    %41 = tpu.matmul %32, %40, %cst_18 {dimension_numbers = #tpu.dot_dimension_numbers<[1], [0], [0], [1], [0, 0, 1, 1], [], []>} : vector<16x32xbf16>, vector<32x32xbf16>, vector<16x32xf32> -> vector<16x32xf32>
    %42 = arith.truncf %35 : vector<16x32xf32> to vector<16x32xbf16>
    %43 = arith.truncf %38 : vector<16x32xf32> to vector<16x32xbf16>
    %cst_19 = arith.constant dense<0.000000e+00> : vector<16x16xf32>
    %44 = tpu.matmul %42, %43, %cst_19 {dimension_numbers = #tpu.dot_dimension_numbers<[1], [1], [0], [0], [0, 0, 1, 0], [], []>} : vector<16x32xbf16>, vector<16x32xbf16>, vector<16x16xf32> -> vector<16x16xf32>
    %cst_20 = arith.constant 0.176776692 : f32
    %45 = vector.broadcast %cst_20 : f32 to vector<16x16xf32>
    %46 = arith.mulf %44, %45 : vector<16x16xf32>
    %47 = arith.addf %46, %0 : vector<16x16xf32>
    %cst_21 = arith.constant dense<0xFF800000> : vector<16xf32>
    %48 = vector.multi_reduction <maximumf>, %47, %cst_21 [1] : vector<16x16xf32> to vector<16xf32>
    %49 = vector.shape_cast %48 : vector<16xf32> to vector<16x1xf32>
    %50 = vector.broadcast %49 : vector<16x1xf32> to vector<16x16xf32>
    %51 = arith.subf %47, %50 : vector<16x16xf32>
    %52 = math.exp %51 : vector<16x16xf32>
    %cst_22 = arith.constant dense<0.000000e+00> : vector<16xf32>
    %53 = vector.multi_reduction <add>, %52, %cst_22 [1] : vector<16x16xf32> to vector<16xf32>
    %54 = vector.shape_cast %53 : vector<16xf32> to vector<16x1xf32>
    %55 = tpu.reciprocal %54 {approx = true} : vector<16x1xf32> -> vector<16x1xf32>
    %56 = vector.broadcast %55 : vector<16x1xf32> to vector<16x16xf32>
    %57 = arith.mulf %52, %56 : vector<16x16xf32>
    %58 = arith.truncf %57 : vector<16x16xf32> to vector<16x16xbf16>
    %59 = arith.truncf %41 : vector<16x32xf32> to vector<16x32xbf16>
    %cst_23 = arith.constant dense<0.000000e+00> : vector<16x32xf32>
    %60 = tpu.matmul %58, %59, %cst_23 {dimension_numbers = #tpu.dot_dimension_numbers<[1], [0], [0], [1], [0, 0, 1, 1], [], []>} : vector<16x16xbf16>, vector<16x32xbf16>, vector<16x32xf32> -> vector<16x32xf32>
    %61 = arith.truncf %60 : vector<16x32xf32> to vector<16x32xbf16>
    %c3 = arith.constant 3 : index
    %c0_24 = arith.constant 0 : index
    %c0_25 = arith.constant 0 : index
    %62 = vector.load %arg2[%c3, %c0_24, %c0_25] : memref<4x32x32xbf16, #tpu.memory_space<vmem>>, vector<1x32x32xbf16>
    %63 = vector.shape_cast %62 : vector<1x32x32xbf16> to vector<32x32xbf16>
    %cst_26 = arith.constant dense<0.000000e+00> : vector<16x32xf32>
    %64 = tpu.matmul %61, %63, %cst_26 {dimension_numbers = #tpu.dot_dimension_numbers<[1], [0], [0], [1], [0, 0, 1, 1], [], []>} : vector<16x32xbf16>, vector<32x32xbf16>, vector<16x32xf32> -> vector<16x32xf32>
    %65 = arith.addf %11, %64 : vector<16x32xf32>
    %cst_27 = arith.constant dense<0.000000e+00> : vector<16xf32>
    %66 = vector.multi_reduction <add>, %65, %cst_27 [1] : vector<16x32xf32> to vector<16xf32>
    %67 = vector.shape_cast %66 : vector<16xf32> to vector<16x1xf32>
    %cst_28 = arith.constant 3.200000e+01 : f32
    %68 = vector.broadcast %cst_28 : f32 to vector<16x1xf32>
    %69 = arith.divf %67, %68 : vector<16x1xf32>
    %70 = vector.broadcast %69 : vector<16x1xf32> to vector<16x32xf32>
    %71 = arith.subf %65, %70 : vector<16x32xf32>
    %72 = arith.mulf %71, %71 : vector<16x32xf32>
    %cst_29 = arith.constant dense<0.000000e+00> : vector<16xf32>
    %73 = vector.multi_reduction <add>, %72, %cst_29 [1] : vector<16x32xf32> to vector<16xf32>
    %74 = vector.shape_cast %73 : vector<16xf32> to vector<16x1xf32>
    %cst_30 = arith.constant 3.200000e+01 : f32
    %75 = vector.broadcast %cst_30 : f32 to vector<16x1xf32>
    %76 = arith.divf %74, %75 : vector<16x1xf32>
    %cst_31 = arith.constant 9.99999974E-6 : f32
    %77 = vector.broadcast %cst_31 : f32 to vector<16x1xf32>
    %78 = arith.addf %76, %77 : vector<16x1xf32>
    %79 = math.rsqrt %78 : vector<16x1xf32>
    %80 = vector.broadcast %79 : vector<16x1xf32> to vector<16x32xf32>
    %81 = arith.mulf %71, %80 : vector<16x32xf32>
    %82 = vector.broadcast %5 : vector<1x32xf32> to vector<16x32xf32>
    %83 = arith.mulf %81, %82 : vector<16x32xf32>
    %84 = vector.broadcast %6 : vector<1x32xf32> to vector<16x32xf32>
    %85 = arith.addf %83, %84 : vector<16x32xf32>
    %86 = arith.truncf %85 : vector<16x32xf32> to vector<16x32xbf16>
    %c0_32 = arith.constant 0 : index
    %c0_33 = arith.constant 0 : index
    %c0_34 = arith.constant 0 : index
    %87 = vector.load %arg3[%c0_32, %c0_33, %c0_34] : memref<2x32x128xbf16, #tpu.memory_space<vmem>>, vector<1x32x128xbf16>
    %88 = vector.shape_cast %87 : vector<1x32x128xbf16> to vector<32x128xbf16>
    %cst_35 = arith.constant dense<0.000000e+00> : vector<16x128xf32>
    %89 = tpu.matmul %86, %88, %cst_35 {dimension_numbers = #tpu.dot_dimension_numbers<[1], [0], [0], [1], [0, 0, 1, 1], [], []>} : vector<16x32xbf16>, vector<32x128xbf16>, vector<16x128xf32> -> vector<16x128xf32>
    %90 = vector.broadcast %10 : vector<1x128xf32> to vector<16x128xf32>
    %91 = arith.addf %89, %90 : vector<16x128xf32>
    %92 = arith.mulf %91, %91 : vector<16x128xf32>
    %93 = arith.mulf %91, %92 : vector<16x128xf32>
    %cst_36 = arith.constant 4.471500e-02 : f32
    %94 = vector.broadcast %cst_36 : f32 to vector<16x128xf32>
    %95 = arith.mulf %94, %93 : vector<16x128xf32>
    %96 = arith.addf %91, %95 : vector<16x128xf32>
    %cst_37 = arith.constant 0.797884583 : f32
    %97 = vector.broadcast %cst_37 : f32 to vector<16x128xf32>
    %98 = arith.mulf %97, %96 : vector<16x128xf32>
    %99 = math.tanh %98 : vector<16x128xf32>
    %cst_38 = arith.constant 1.000000e+00 : f32
    %100 = vector.broadcast %cst_38 : f32 to vector<16x128xf32>
    %101 = arith.addf %100, %99 : vector<16x128xf32>
    %cst_39 = arith.constant 5.000000e-01 : f32
    %102 = vector.broadcast %cst_39 : f32 to vector<16x128xf32>
    %103 = arith.mulf %102, %101 : vector<16x128xf32>
    %104 = arith.mulf %91, %103 : vector<16x128xf32>
    %105 = arith.truncf %104 : vector<16x128xf32> to vector<16x128xbf16>
    %c0_40 = arith.constant 0 : index
    %c0_41 = arith.constant 0 : index
    %106 = vector.load %arg4[%c0_40, %c0_41] : memref<128x32xbf16, #tpu.memory_space<vmem>>, vector<128x32xbf16>
    %cst_42 = arith.constant dense<0.000000e+00> : vector<16x32xf32>
    %107 = tpu.matmul %105, %106, %cst_42 {dimension_numbers = #tpu.dot_dimension_numbers<[1], [0], [0], [1], [0, 0, 1, 1], [], []>} : vector<16x128xbf16>, vector<128x32xbf16>, vector<16x32xf32> -> vector<16x32xf32>
    %108 = arith.addf %65, %107 : vector<16x32xf32>
    %109 = vector.broadcast %9 : vector<1x32xf32> to vector<16x32xf32>
    %110 = arith.addf %108, %109 : vector<16x32xf32>
    %cst_43 = arith.constant dense<0.000000e+00> : vector<16xf32>
    %111 = vector.multi_reduction <add>, %110, %cst_43 [1] : vector<16x32xf32> to vector<16xf32>
    %112 = vector.shape_cast %111 : vector<16xf32> to vector<16x1xf32>
    %cst_44 = arith.constant 3.200000e+01 : f32
    %113 = vector.broadcast %cst_44 : f32 to vector<16x1xf32>
    %114 = arith.divf %112, %113 : vector<16x1xf32>
    %115 = vector.broadcast %114 : vector<16x1xf32> to vector<16x32xf32>
    %116 = arith.subf %110, %115 : vector<16x32xf32>
    %117 = arith.mulf %116, %116 : vector<16x32xf32>
    %cst_45 = arith.constant dense<0.000000e+00> : vector<16xf32>
    %118 = vector.multi_reduction <add>, %117, %cst_45 [1] : vector<16x32xf32> to vector<16xf32>
    %119 = vector.shape_cast %118 : vector<16xf32> to vector<16x1xf32>
    %cst_46 = arith.constant 3.200000e+01 : f32
    %120 = vector.broadcast %cst_46 : f32 to vector<16x1xf32>
    %121 = arith.divf %119, %120 : vector<16x1xf32>
    %cst_47 = arith.constant 9.99999974E-6 : f32
    %122 = vector.broadcast %cst_47 : f32 to vector<16x1xf32>
    %123 = arith.addf %121, %122 : vector<16x1xf32>
    %124 = math.rsqrt %123 : vector<16x1xf32>
    %125 = vector.broadcast %124 : vector<16x1xf32> to vector<16x32xf32>
    %126 = arith.mulf %116, %125 : vector<16x32xf32>
    %127 = vector.broadcast %7 : vector<1x32xf32> to vector<16x32xf32>
    %128 = arith.mulf %126, %127 : vector<16x32xf32>
    %129 = vector.broadcast %8 : vector<1x32xf32> to vector<16x32xf32>
    %130 = arith.addf %128, %129 : vector<16x32xf32>
    %131 = arith.truncf %130 : vector<16x32xf32> to vector<16x32xbf16>
    %c1_48 = arith.constant 1 : index
    %c0_49 = arith.constant 0 : index
    %c0_50 = arith.constant 0 : index
    %132 = vector.load %arg3[%c1_48, %c0_49, %c0_50] : memref<2x32x128xbf16, #tpu.memory_space<vmem>>, vector<1x32x128xbf16>
    %133 = vector.shape_cast %132 : vector<1x32x128xbf16> to vector<32x128xbf16>
    %cst_51 = arith.constant dense<0.000000e+00> : vector<16x128xf32>
    %134 = tpu.matmul %131, %133, %cst_51 {dimension_numbers = #tpu.dot_dimension_numbers<[1], [0], [0], [1], [0, 0, 1, 1], [], []>} : vector<16x32xbf16>, vector<32x128xbf16>, vector<16x128xf32> -> vector<16x128xf32>
    %c0_52 = arith.constant 0 : index
    %c0_53 = arith.constant 0 : index
    %135 = vector.load %arg5[%c0_52, %c0_53] : memref<16x128xf32, #tpu.memory_space<vmem>>, vector<16x128xf32>
    tpu.vector_store %arg5[%c0_52, %c0_53], %134 {strides = array<i32>} : memref<16x128xf32, #tpu.memory_space<vmem>>, vector<16x128xf32>,
    %cst_54 = arith.constant dense<0xFF800000> : vector<16xf32>
    %136 = vector.multi_reduction <maximumf>, %134, %cst_54 [1] : vector<16x128xf32> to vector<16xf32>
    %137 = vector.shape_cast %136 : vector<16xf32> to vector<16x1xf32>
    %138 = vector.broadcast %137 : vector<16x1xf32> to vector<16x128xf32>
    %139 = arith.subf %134, %138 : vector<16x128xf32>
    %140 = math.exp %139 : vector<16x128xf32>
    %cst_55 = arith.constant dense<0.000000e+00> : vector<16xf32>
    %141 = vector.multi_reduction <add>, %140, %cst_55 [1] : vector<16x128xf32> to vector<16xf32>
    %142 = vector.shape_cast %141 : vector<16xf32> to vector<16x1xf32>
    %143 = math.log %142 : vector<16x1xf32>
    %144 = arith.addf %137, %143 : vector<16x1xf32>
    %145 = arith.mulf %1, %134 : vector<16x128xf32>
    %cst_56 = arith.constant dense<0.000000e+00> : vector<16xf32>
    %146 = vector.multi_reduction <add>, %145, %cst_56 [1] : vector<16x128xf32> to vector<16xf32>
    %147 = vector.shape_cast %146 : vector<16xf32> to vector<16x1xf32>
    %cst_57 = arith.constant dense<0.000000e+00> : vector<16xf32>
    %148 = vector.multi_reduction <add>, %1, %cst_57 [1] : vector<16x128xf32> to vector<16xf32>
    %149 = vector.shape_cast %148 : vector<16xf32> to vector<16x1xf32>
    %150 = arith.mulf %144, %149 : vector<16x1xf32>
    %151 = arith.subf %150, %147 : vector<16x1xf32>
    %152 = vector.extract_strided_slice %151 {offsets = [0, 0], sizes = [8, 1], strides = [1, 1]} : vector<16x1xf32> to vector<8x1xf32>
    %cst_58 = arith.constant dense<0.000000e+00> : vector<1xf32>
    %153 = vector.multi_reduction <add>, %152, %cst_58 [0] : vector<8x1xf32> to vector<1xf32>
    %154 = vector.shape_cast %153 : vector<1xf32> to vector<1x1xf32>
    %155 = vector.extract_strided_slice %149 {offsets = [0, 0], sizes = [8, 1], strides = [1, 1]} : vector<16x1xf32> to vector<8x1xf32>
    %cst_59 = arith.constant dense<0.000000e+00> : vector<1xf32>
    %156 = vector.multi_reduction <add>, %155, %cst_59 [0] : vector<8x1xf32> to vector<1xf32>
    %157 = vector.shape_cast %156 : vector<1xf32> to vector<1x1xf32>
    %cst_60 = arith.constant 1.000000e+00 : f32
    %158 = vector.broadcast %cst_60 : f32 to vector<1x1xf32>
    %159 = arith.maximumf %157, %158 : vector<1x1xf32>
    %160 = arith.divf %154, %159 : vector<1x1xf32>
    %161 = vector.extract_strided_slice %151 {offsets = [8, 0], sizes = [8, 1], strides = [1, 1]} : vector<16x1xf32> to vector<8x1xf32>
    %cst_61 = arith.constant dense<0.000000e+00> : vector<1xf32>
    %162 = vector.multi_reduction <add>, %161, %cst_61 [0] : vector<8x1xf32> to vector<1xf32>
    %163 = vector.shape_cast %162 : vector<1xf32> to vector<1x1xf32>
    %164 = vector.extract_strided_slice %149 {offsets = [8, 0], sizes = [8, 1], strides = [1, 1]} : vector<16x1xf32> to vector<8x1xf32>
    %cst_62 = arith.constant dense<0.000000e+00> : vector<1xf32>
    %165 = vector.multi_reduction <add>, %164, %cst_62 [0] : vector<8x1xf32> to vector<1xf32>
    %166 = vector.shape_cast %165 : vector<1xf32> to vector<1x1xf32>
    %cst_63 = arith.constant 1.000000e+00 : f32
    %167 = vector.broadcast %cst_63 : f32 to vector<1x1xf32>
    %168 = arith.maximumf %166, %167 : vector<1x1xf32>
    %169 = arith.divf %163, %168 : vector<1x1xf32>
    %cst_64 = arith.constant 0.000000e+00 : f32
    %170 = vector.broadcast %cst_64 : f32 to vector<1x1xf32>
    %171 = arith.addf %170, %160 : vector<1x1xf32>
    %172 = arith.addf %171, %169 : vector<1x1xf32>
    %cst_65 = arith.constant 5.000000e-01 : f32
    %173 = vector.broadcast %cst_65 : f32 to vector<1x1xf32>
    %174 = arith.mulf %172, %173 : vector<1x1xf32>
    %175 = vector.shape_cast %174 : vector<1x1xf32> to vector<1x1xf32>
    %176 = vector.broadcast %175 : vector<1x1xf32> to vector<8x128xf32>
    %c0_66 = arith.constant 0 : index
    %c0_67 = arith.constant 0 : index
    %177 = vector.load %arg6[%c0_66, %c0_67] : memref<8x128xf32, #tpu.memory_space<vmem>>, vector<8x128xf32>
    tpu.vector_store %arg6[%c0_66, %c0_67], %176 {strides = array<i32>} : memref<8x128xf32, #tpu.memory_space<vmem>>, vector<8x128xf32>,
    return
  }
}

</mosaic_0001>

<bundles_post_ra>
// kernel: tpu_custom_call.1
= control target key start
LH: loop header
LB: loop body
LE: loop exit
PB: predicated region body
PF: predicated region fallthrough
CT: control target
= control target key end

     0   :  { %12 = vsyncpa [#allocation3], 0  ;;  %s1471_s0 = inlined_call_operand.vmem [shape: f32[16,32], index: 0, kind: input, shape index: {}]   ;;  %s1472_s1 = inlined_call_operand.hbm [shape: f32[40,128], index: 1, kind: input, shape index: {}]   ;;  %s1473_s2 = inlined_call_operand.vmem [shape: bf16[4,32,32], index: 2, kind: input, shape index: {}]   ;;  %s1474_s3 = inlined_call_operand.hbm [shape: bf16[2,32,128], index: 3, kind: input, shape index: {}]   ;;  %s1475_s4 = inlined_call_operand.vmem [shape: bf16[128,32], index: 4, kind: input, shape index: {}]   ;;  %s1476_s5 = inlined_call_operand.hbm [shape: f32[16,128], index: 5, kind: output, shape index: {0}]   ;;  %s1477_s6 = inlined_call_operand.hbm [shape: f32[8,128], index: 6, kind: output, shape index: {1}]  }
   0x1   :  { %13 = vsyncpa [#allocation6], 0 }
   0x2   :  { %14 = vsyncpa [#allocation4], 0 }
   0x3   :  { %15 = vsyncpa [#allocation9], 0  ;;  %s1213_s21 = smov [#allocation2]   ;;  %s1117_s25 = scalar_lea.hbm %s1472_s1, 640 }
   0x4   :  { %s23_s22 = sshll.u32 %s1213_s21, 4  ;;  %p1118_p0 = scmp.ne.s32.totalorder %s1472_s1, %s1117_s25  ;;  %s24_s22 = int_to_ptr.vmem [resolvable:$true] %s23_s22 }
   0x5   :  { %p1121_p1 = scmp.lt.u32.totalorder %s1117_s25, %s1472_s1 }
   0x7   :  { %p1123_p2 = pnand %p1121_p1, %p1118_p0 }
   0x9   :  { %1126 = shalt.err (!%p1123_p2)
}
   0xa   :  { %s1127_s30 = scalar_lea.vmem %s24_s22, 640  ;;  %p1132_p4 = scmp.lt.s32.totalorder %s24_s22, %s24_s22 }
   0xb   :  { %p1128_p3 = scmp.ne.s32.totalorder %s24_s22, %s1127_s30  ;;  %p1133_p5 = scmp.lt.s32.totalorder %s1127_s30, %s1127_s30 }
   0xd   :  { %p1134_p6 = por %p1133_p5, %p1132_p4 }
   0xf   :  { %p1135_p7 = pnand %p1134_p6, %p1128_p3 }
  0x11   :  { %1138 = shalt.err (!%p1135_p7)
}
  0x12   :  { %s1214_s7 = smov 128   ;;  %s1215_s8 = smov 8  }
  0x13   :  { %29 = dma.hbm_to_vmem [thread:$0]  %s1472_s1, 640, %s24_s22, [#allocation3], %s1214_s7, %s1214_s7, %s1215_s8  }
  0x14   :  { %s1216_s11 = smov [#allocation5]   ;;  %s1139_s15 = scalar_lea.hbm %s1474_s3, 512 }
  0x15   :  { %s37_s12 = sshll.u32 %s1216_s11, 4  ;;  %p1140_p8 = scmp.ne.s32.totalorder %s1474_s3, %s1139_s15  ;;  %s38_s12 = int_to_ptr.vmem [resolvable:$true] %s37_s12 }
  0x16   :  { %p1143_p9 = scmp.lt.u32.totalorder %s1139_s15, %s1474_s3 }
  0x18   :  { %p1145_p10 = pnand %p1143_p9, %p1140_p8 }
  0x1a   :  { %1148 = shalt.err (!%p1145_p10)
}
  0x1b   :  { %s1149_s20 = scalar_lea.vmem %s38_s12, 512  ;;  %p1154_p12 = scmp.lt.s32.totalorder %s38_s12, %s38_s12 }
  0x1c   :  { %p1150_p11 = scmp.ne.s32.totalorder %s38_s12, %s1149_s20  ;;  %p1155_p13 = scmp.lt.s32.totalorder %s1149_s20, %s1149_s20 }
  0x1e   :  { %p1156_p0 = por %p1155_p13, %p1154_p12 }
  0x20   :  { %p1157_p1 = pnand %p1156_p0, %p1150_p11 }
  0x22   :  { %1160 = shalt.err (!%p1157_p1)
}
  0x23   :  { %s1217_s1 = smov 64   ;;  %s1218_s21 = smov 4  }
  0x24   :  { %43 = dma.hbm_to_vmem [thread:$0]  %s1474_s3, 512, %s38_s12, [#allocation6], %s1217_s1, %s1217_s1, %s1218_s21  }
  0x25   :  { %1205 = dma.done.wait [#allocation3], 640  }
  0x26   :  { %1206 = vsyncadd [#allocation3], 4294966656 }
  0x27   :  { %1207 = dma.done.wait [#allocation6], 512  }
  0x28   :  { %1208 = vsyncadd [#allocation6], 4294966784  ;;  %vm60_vm0 = vcmask 261120   ;;  %v1288_v0 = vld [vmem:[%s1471_s0] sm:$0xff]  ;;  %v1293_v1 = vld [vmem:[%s1471_s0 + $0x8] sm:$0xff]  ;;  %v1219_v15 = vmov 0.0   ;;  %v88_v21 = vlaneseq }
  0x29   :  { %v61_v2 = vsel %vm60_vm0, %v1288_v0, 0.0  ;;  %v64_v3 = vsel %vm60_vm0, %v1293_v1, 0.0  ;;  %v1061_v14 = vld [vmem:[%s1473_s2] sm:$0xff]   ;;  %971 = vmatprep.subr.bf16.mxu0 %v1219_v15  ;;  %995 = vmatprep.subr.bf16.mxu1 %v1219_v15  ;;  %v1062_v16 = vld [vmem:[%s1473_s2 + $0x8] sm:$0xff]   ;;  %vm1220_vm1 = vmmov 0   ;;  %v1063_v38 = vld [vmem:[%s1473_s2 + $0x10] sm:$0xff]  }
  0x2a   :  { %62 = vadd.xlane.f32.xlu0 %v61_v2  ;;  %972 = vmatpush3.bf16.msra.mxu0 %v1061_v14  ;;  %v1317_v24 = vshrl.u32 %v88_v21, 7  ;;  %v1320_v26 = vld [vmem:[#allocation2 + $0x20] sm:$0xff]  ;;  %v1064_v40 = vld [vmem:[%s1473_s2 + $0x18] sm:$0xff]   ;;  %v1066_v42 = vld [vmem:[%s1473_s2 + $0x28] sm:$0xff]   ;;  %vm330_vm2 = vcmask 130048  }
  0x2b   :  { %975 = vmatprep.mubr.msk.bf16.mxu0 %vm1220_vm1, %v1219_v15  ;;  %973 = vmatprep.subr.bf16.mxu0 %v1219_v15  ;;  %v1065_v41 = vld [vmem:[%s1473_s2 + $0x20] sm:$0xff]   ;;  %v54_v2 = vld [vmem:[#allocation2 + $0x8] sm:$0xff] }
  0x2c   :  { %997 = vmatprep.mubr.msk.bf16.mxu1 %vm1220_vm1, %v1219_v15  ;;  %v90_v25 = vsub.s32 0, %v1317_v24  ;;  %v96_v30 = vsub.s32 1, %v1317_v24  ;;  %v53_v60 = vld [vmem:[#allocation2] sm:$0xff] }
  0x2e   :  { %65 = vadd.xlane.f32.xlu0 %v64_v3  ;;  %974 = vmatpush3.bf16.msra.mxu0 %v1062_v16  ;;  %v91_v29 = vrot.slane %v1320_v26, %v90_v25  ;;  %v97_v34 = vrot.slane %v1320_v26, %v96_v30  ;;  %v1068_v30 = vld [vmem:[%s1473_s2 + $0x38] sm:$0xff]  }
  0x2f   :  { %979 = vmatprep.subr.bf16.mxu0 %v1219_v15 }
  0xb7   :  { %v63_v4 = vpop.xlane.xlu0 %62 }
  0xb8   :  { %v68_v5 = vmul.f32 0.03125, %v63_v4 }
  0xba   :  { %v70_v6 = vsub.f32 %v1288_v0, %v68_v5 }
  0xbb   :  { %v66_v7 = vpop.xlane.xlu0 %65 }
  0xbc   :  { %v69_v8 = vmul.f32 0.03125, %v66_v7  ;;  %v72_v9 = vmul.f32 %v70_v6, %v70_v6 }
  0xbe   :  { %v71_v10 = vsub.f32 %v1293_v1, %v69_v8  ;;  %v74_v11 = vsel %vm60_vm0, %v72_v9, 0.0 }
  0xbf   :  { %75 = vadd.xlane.f32.xlu1 %v74_v11 }
  0xc0   :  { %v73_v12 = vmul.f32 %v71_v10, %v71_v10 }
  0xc2   :  { %v77_v13 = vsel %vm60_vm0, %v73_v12, 0.0 }
  0xc3   :  { %78 = vadd.xlane.f32.xlu1 %v77_v13 }
 0x14c   :  { %v76_v17 = vpop.xlane.xlu1 %75 }
 0x14d   :  { %v80_v18 = vmul.f32 0.03125, %v76_v17 }
 0x14f   :  { %v82_v19 = vadd.f32 1e-05, %v80_v18 }
 0x150   :  { %v79_v20 = vpop.xlane.xlu1 %78 }
 0x151   :  { %1081 = vrsqrt.f32 %v82_v19  ;;  %v81_v22 = vmul.f32 0.03125, %v79_v20  ;;  %v1067_v20 = vld [vmem:[%s1473_s2 + $0x30] sm:$0xff]  }
 0x153   :  { %v83_v23 = vadd.f32 1e-05, %v81_v22 }
 0x155   :  { %1083 = vrsqrt.f32 %v83_v23 }
 0x15b   :  { %v1082_v27 = vpop.eup %1081 }
 0x15c   :  { %v86_v28 = vmul.f32 %v1082_v27, %v70_v6 }
 0x15e   :  { %v92_v33 = vmul.f32 %v91_v29, %v86_v28 }
 0x15f   :  { %v1084_v31 = vpop.eup %1083 }
 0x160   :  { %v87_v32 = vmul.f32 %v1084_v31, %v71_v10  ;;  %v98_v36 = vadd.f32 %v97_v34, %v92_v33 }
 0x162   :  { %v93_v35 = vmul.f32 %v91_v29, %v87_v32 }
 0x164   :  { %v99_v37 = vadd.f32 %v97_v34, %v93_v35 }
 0x166   :  { %v100_v39 = vpack.c.bf16 %v99_v37, %v98_v36 }
 0x168   :  { %976 = vmatmul.mubr.msk.bf16.vlgmr.msra.gmra.mrb[0].mxu0 %vm60_vm0, %v100_v39 }
 0x169   :  { %980 = vmatpush3.bf16.msra.mxu0 %v1063_v38  ;;  %983 = vmatprep.mubr.msk.bf16.mxu0 %vm1220_vm1, %v1219_v15 }
 0x16a   :  { %981 = vmatprep.subr.bf16.mxu0 %v1219_v15 }
 0x16d   :  { %982 = vmatpush3.bf16.msra.mxu0 %v1064_v40 }
 0x16e   :  { %987 = vmatprep.subr.bf16.mxu0 %v1219_v15 }
 0x170   :  { %984 = vmatmul.mubr.msk.bf16.vlgmr.msra.gmra.mrb[4].mxu0 %vm60_vm0, %v100_v39 }
 0x171   :  { %988 = vmatpush3.bf16.msra.mxu0 %v1065_v41  ;;  %991 = vmatprep.mubr.msk.bf16.mxu0 %vm1220_vm1, %v1219_v15 }
 0x172   :  { %989 = vmatprep.subr.bf16.mxu0 %v1219_v15 }
 0x175   :  { %990 = vmatpush3.bf16.msra.mxu0 %v1066_v42 }
 0x176   :  { %1001 = vmatprep.subr.bf16.mxu0 %v1219_v15 }
 0x178   :  { %992 = vmatmul.mubr.msk.bf16.vlgmr.msra.gmra.mrb[8].mxu0 %vm60_vm0, %v100_v39 }
 0x179   :  { %1003 = vmatprep.mubr.msk.bf16.mxu0 %vm1220_vm1, %v1219_v15 }
 0x23b   :  { %v154_v43 = vpop.f32.mrb[0].mxu0 }
 0x23c   :  { %v977_v44 = vpop.f32.mrb[1].mxu0 }
 0x23d   :  { %v157_v45 = vpop.f32.mrb[2].mxu0 }
 0x23e   :  { %v277_v46 = vpack.c.bf16 %v157_v45, %v154_v43  ;;  %v978_v47 = vpop.f32.mrb[3].mxu0 }
 0x243   :  { %v212_v48 = vpop.f32.mrb[4].mxu0 }
 0x244   :  { %v985_v49 = vpop.f32.mrb[5].mxu0 }
 0x245   :  { %v215_v50 = vpop.f32.mrb[6].mxu0 }
 0x246   :  { %v278_v51 = vpack.c.bf16 %v215_v50, %v212_v48  ;;  %v986_v52 = vpop.f32.mrb[7].mxu0 }
 0x247   :  { %v1069_v52 = vld [vmem:[#allocation5] sm:$0xff]  }
 0x248   :  { %v283_v53 = vsel %vm60_vm0, %v278_v51, 0 }
 0x249   :  { %996 = vmatpush3.bf16.xpose.msra.mxu1 %v283_v53  ;;  %v1070_v53 = vld [vmem:[#allocation5 + $0x8] sm:$0xff]  }
 0x24a   :  { %1007 = vmatprep.subr.bf16.mxu1 %v1219_v15 }
 0x24b   :  { %v270_v54 = vpop.f32.mrb[8].mxu0 }
 0x24c   :  { %v993_v55 = vpop.f32.mrb[9].mxu0 }
 0x24d   :  { %v273_v56 = vpop.f32.mrb[10].mxu0 }
 0x24e   :  { %v354_v57 = vpack.c.bf16 %v273_v56, %v270_v54  ;;  %v994_v58 = vpop.f32.mrb[11].mxu0 }
 0x250   :  { %998 = vmatmul.mubr.msk.bf16.vlgmr.msra.gmra.mrb[0].mxu1 %vm60_vm0, %v277_v46  ;;  %1002 = vmatpush3.bf16.msra.mxu0 %v354_v57 }
 0x251   :  { %1011 = vmatprep.mubr.msk.bf16.mxu1 %vm1220_vm1, %v1219_v15  ;;  %1015 = vmatprep.subr.bf16.mxu0 %v1219_v15 }
 0x252   :  { %1008 = vmatpush3.bf16.msra.mxu1 %v1067_v20  ;;  %v508_v20 = vsub.s32 7, %v1317_v24 }
 0x253   :  { %1009 = vmatprep.subr.bf16.mxu1 %v1219_v15 }
 0x256   :  { %1010 = vmatpush3.bf16.msra.mxu1 %v1068_v30 }
 0x257   :  { %1023 = vmatprep.subr.bf16.mxu1 %v1219_v15 }
 0x323   :  { %v319_v59 = vpop.f32.mrb[0].mxu1 }
 0x324   :  { %v326_v61 = vmul.f32 0.17677669, %v319_v59  ;;  %v999_v62 = vpop.f32.mrb[1].mxu1 }
 0x325   :  { %v322_v63 = vpop.f32.mrb[2].mxu1  ;;  %v497_v62 = vsub.s32 3, %v1317_v24 }
 0x326   :  { %v327_v3 = vmul.f32 0.17677669, %v322_v63  ;;  %v1000_v4 = vpop.f32.mrb[3].mxu1  ;;  %v328_v5 = vadd.f32 %v326_v61, %v53_v60  ;;  %v491_v60 = vsub.s32 2, %v1317_v24 }
 0x328   :  { %v331_v6 = vsel %vm330_vm2, %v328_v5, -inf  ;;  %v329_v7 = vadd.f32 %v327_v3, %v54_v2  ;;  %v492_v61 = vrot.slane %v1320_v26, %v491_v60 }
 0x329   :  { %332 = vmax.xlane.f32.xlu0 %v331_v6  ;;  %v498_v6 = vrot.slane %v1320_v26, %v497_v62 }
 0x32a   :  { %v334_v8 = vsel %vm330_vm2, %v329_v7, -inf }
 0x32b   :  { %335 = vmax.xlane.f32.xlu1 %v334_v8 }
 0x3b6   :  { %v333_v9 = vpop.xlane.xlu0 %332 }
 0x3b7   :  { %v337_v10 = vsub.f32 %v328_v5, %v333_v9 }
 0x3b8   :  { %v336_v11 = vpop.xlane.xlu1 %335 }
 0x3b9   :  { %v339_v12 = vmul.f32 1.442695, %v337_v10  ;;  %v338_v13 = vsub.f32 %v329_v7, %v336_v11  ;;  %v1071_v11 = vld [vmem:[%s1475_s4] sm:$0xff]  }
 0x3bb   :  { %1085 = vpow2.f32 %v339_v12  ;;  %v341_v14 = vmul.f32 1.442695, %v338_v13  ;;  %v1072_v12 = vld [vmem:[%s1475_s4 + $0x8] sm:$0xff]   ;;  %v1073_v13 = vld [vmem:[%s1475_s4 + $0x10] sm:$0xff]  }
 0x3bd   :  { %1087 = vpow2.f32 %v341_v14  ;;  %v1074_v14 = vld [vmem:[%s1475_s4 + $0x18] sm:$0xff]  }
 0x3c5   :  { %v1086_v16 = vpop.eup %1085 }
 0x3c6   :  { %v343_v17 = vsel %vm330_vm2, %v1086_v16, 0.0 }
 0x3c7   :  { %v1088_v18 = vpop.eup %1087  ;;  %344 = vadd.xlane.f32.xlu0 %v343_v17  ;;  %v1076_v17 = vld [vmem:[%s1475_s4 + $0x28] sm:$0xff]  }
 0x3c8   :  { %v346_v19 = vsel %vm330_vm2, %v1088_v18, 0.0 }
 0x3c9   :  { %347 = vadd.xlane.f32.xlu1 %v346_v19  ;;  %v1078_v19 = vld [vmem:[%s1475_s4 + $0x38] sm:$0xff]  }
 0x454   :  { %v345_v21 = vpop.xlane.xlu0 %344 }
 0x455   :  { %1089 = vrcp.f32 %v345_v21  ;;  %v509_v21 = vrot.slane %v1320_v26, %v508_v20 }
 0x456   :  { %v348_v22 = vpop.xlane.xlu1 %347 }
 0x457   :  { %1091 = vrcp.f32 %v348_v22 }
 0x45f   :  { %v1090_v23 = vpop.eup %1089 }
 0x460   :  { %v351_v27 = vmul.f32 %v1090_v23, %v1086_v16  ;;  %v1075_v16 = vld [vmem:[%s1475_s4 + $0x20] sm:$0xff]  }
 0x461   :  { %v1092_v25 = vpop.eup %1091 }
 0x462   :  { %v352_v28 = vmul.f32 %v1092_v25, %v1088_v18  ;;  %v1077_v18 = vld [vmem:[%s1475_s4 + $0x30] sm:$0xff]   ;;  %s1221_s4 = smov [#allocation7]  }
 0x463   :  { %s873_s10 = sshll.u32 %s1221_s4, 4  ;;  %s874_s10 = int_to_ptr.vmem [resolvable:$true] %s873_s10 }
 0x464   :  { %v353_v29 = vpack.c.bf16 %v352_v28, %v351_v27  ;;  %s1161_s11 = scalar_lea.vmem %s874_s10, 256  ;;  %p1166_p3 = scmp.lt.s32.totalorder %s874_s10, %s874_s10 }
 0x465   :  { %p1162_p2 = scmp.ne.s32.totalorder %s874_s10, %s1161_s11  ;;  %p1167_p4 = scmp.lt.s32.totalorder %s1161_s11, %s1161_s11 }
 0x466   :  { %1004 = vmatmul.mubr.msk.bf16.vlgmr.msra.gmra.mrb[12].mxu0 %vm330_vm2, %v353_v29 }
 0x467   :  { %1019 = vmatprep.mubr.msk.bf16.mxu0 %vm1220_vm1, %v1219_v15  ;;  %1016 = vmatpush3.bf16.msra.mxu0 %v1069_v52  ;;  %p1168_p5 = por %p1167_p4, %p1166_p3 }
 0x468   :  { %1017 = vmatprep.subr.bf16.mxu0 %v1219_v15 }
 0x469   :  { %p1169_p6 = pnand %p1168_p5, %p1162_p2 }
 0x46b   :  { %1018 = vmatpush3.bf16.msra.mxu0 %v1070_v53 }
 0x46c   :  { %1043 = vmatprep.subr.bf16.mxu0 %v1219_v15 }
 0x539   :  { %v392_v31 = vpop.f32.mrb[12].mxu0 }
 0x53a   :  { %v1005_v32 = vpop.f32.mrb[13].mxu0 }
 0x53b   :  { %v395_v33 = vpop.f32.mrb[14].mxu0 }
 0x53c   :  { %v399_v34 = vpack.c.bf16 %v395_v33, %v392_v31  ;;  %v1006_v35 = vpop.f32.mrb[15].mxu0 }
 0x53e   :  { %1012 = vmatmul.mubr.msk.bf16.vlgmr.msra.gmra.mrb[4].mxu1 %vm60_vm0, %v399_v34 }
 0x53f   :  { %1039 = vmatprep.mubr.msk.bf16.mxu1 %vm1220_vm1, %v1219_v15  ;;  %1024 = vmatpush3.bf16.msra.mxu1 %v1071_v11 }
 0x540   :  { %1025 = vmatprep.subr.bf16.mxu1 %v1219_v15 }
 0x543   :  { %1026 = vmatpush3.bf16.msra.mxu1 %v1072_v12 }
 0x544   :  { %1027 = vmatprep.subr.bf16.mxu1 %v1219_v15 }
 0x547   :  { %1028 = vmatpush3.bf16.msra.mxu1 %v1073_v13 }
 0x548   :  { %1029 = vmatprep.subr.bf16.mxu1 %v1219_v15 }
 0x54b   :  { %1030 = vmatpush3.bf16.msra.mxu1 %v1074_v14 }
 0x54c   :  { %1031 = vmatprep.subr.bf16.mxu1 %v1219_v15 }
 0x54f   :  { %1032 = vmatpush3.bf16.msra.mxu1 %v1075_v16  ;;  %v726_v16 = vsub.s32 4, %v1317_v24 }
 0x550   :  { %1033 = vmatprep.subr.bf16.mxu1 %v1219_v15 }
 0x553   :  { %1034 = vmatpush3.bf16.msra.mxu1 %v1076_v17  ;;  %v727_v17 = vrot.slane %v1320_v26, %v726_v16 }
 0x554   :  { %1035 = vmatprep.subr.bf16.mxu1 %v1219_v15 }
 0x557   :  { %1036 = vmatpush3.bf16.msra.mxu1 %v1077_v18  ;;  %v732_v18 = vsub.s32 5, %v1317_v24 }
 0x558   :  { %1037 = vmatprep.subr.bf16.mxu1 %v1219_v15 }
 0x55b   :  { %1038 = vmatpush3.bf16.msra.mxu1 %v1078_v19 }
 0x611   :  { %v454_v36 = vpop.f32.mrb[4].mxu1 }
 0x612   :  { %v1375_v37 = vadd.f32 %v454_v36, %v1288_v0  ;;  %v1013_v38 = vpop.f32.mrb[5].mxu1 }
 0x613   :  { %v457_v39 = vpop.f32.mrb[6].mxu1 }
 0x614   :  { %v1378_v40 = vadd.f32 %v457_v39, %v1293_v1  ;;  %v1014_v41 = vpop.f32.mrb[7].mxu1  ;;  %v463_v42 = vsel %vm60_vm0, %v1375_v37, 0.0 }
 0x615   :  { %464 = vadd.xlane.f32.xlu0 %v463_v42 }
 0x616   :  { %v466_v43 = vsel %vm60_vm0, %v1378_v40, 0.0 }
 0x617   :  { %467 = vadd.xlane.f32.xlu1 %v466_v43 }
 0x6a2   :  { %v465_v44 = vpop.xlane.xlu0 %464 }
 0x6a3   :  { %v469_v45 = vmul.f32 0.03125, %v465_v44 }
 0x6a4   :  { %v468_v46 = vpop.xlane.xlu1 %467 }
 0x6a5   :  { %v471_v0 = vsub.f32 %v1375_v37, %v469_v45  ;;  %v470_v47 = vmul.f32 0.03125, %v468_v46 }
 0x6a7   :  { %v472_v48 = vsub.f32 %v1378_v40, %v470_v47  ;;  %v473_v49 = vmul.f32 %v471_v0, %v471_v0 }
 0x6a9   :  { %v475_v1 = vsel %vm60_vm0, %v473_v49, 0.0  ;;  %v474_v50 = vmul.f32 %v472_v48, %v472_v48 }
 0x6aa   :  { %476 = vadd.xlane.f32.xlu0 %v475_v1  ;;  %v694_v1 = vsub.s32 6, %v1317_v24 }
 0x6ab   :  { %v478_v51 = vsel %vm60_vm0, %v474_v50, 0.0 }
 0x6ac   :  { %479 = vadd.xlane.f32.xlu1 %v478_v51  ;;  %v695_v50 = vrot.slane %v1320_v26, %v694_v1 }
 0x737   :  { %v477_v54 = vpop.xlane.xlu0 %476 }
 0x738   :  { %v481_v55 = vmul.f32 0.03125, %v477_v54 }
 0x739   :  { %v480_v56 = vpop.xlane.xlu1 %479 }
 0x73a   :  { %v483_v57 = vadd.f32 1e-05, %v481_v55  ;;  %v482_v58 = vmul.f32 0.03125, %v480_v56 }
 0x73c   :  { %1093 = vrsqrt.f32 %v483_v57  ;;  %v484_v59 = vadd.f32 1e-05, %v482_v58 }
 0x73e   :  { %1095 = vrsqrt.f32 %v484_v59 }
 0x746   :  { %v1094_v63 = vpop.eup %1093 }
 0x747   :  { %v487_v2 = vmul.f32 %v1094_v63, %v471_v0 }
 0x748   :  { %v1096_v3 = vpop.eup %1095 }
 0x749   :  { %v493_v4 = vmul.f32 %v492_v61, %v487_v2  ;;  %v488_v5 = vmul.f32 %v1096_v3, %v472_v48 }
 0x74b   :  { %v494_v7 = vmul.f32 %v492_v61, %v488_v5  ;;  %v499_v8 = vadd.f32 %v498_v6, %v493_v4 }
 0x74d   :  { %v500_v9 = vadd.f32 %v498_v6, %v494_v7  ;;  %v1079_v7 = vld [vmem:[#allocation5 + $0x10] sm:$0xff]  }
 0x74f   :  { %v501_v10 = vpack.c.bf16 %v500_v9, %v499_v8  ;;  %v1080_v8 = vld [vmem:[#allocation5 + $0x18] sm:$0xff]  }
 0x751   :  { %1020 = vmatmul.mubr.msk.bf16.vlgmr.msra.gmra.mrb[16].mxu0 %vm60_vm0, %v501_v10 }
 0x752   :  { %1047 = vmatprep.mubr.msk.bf16.mxu0 %vm1220_vm1, %v1219_v15  ;;  %1044 = vmatpush3.bf16.msra.mxu0 %v1079_v7 }
 0x753   :  { %1045 = vmatprep.subr.bf16.mxu0 %v1219_v15 }
 0x756   :  { %1046 = vmatpush3.bf16.msra.mxu0 %v1080_v8 }
 0x824   :  { %v559_v22 = vpop.f32.mrb[16].mxu0 }
 0x825   :  { %v560_v23 = vadd.f32 %v559_v22, %v509_v21  ;;  %v1021_v25 = vpop.f32.mrb[17].mxu0 }
 0x826   :  { %v562_v27 = vpop.f32.mrb[18].mxu0 }
 0x827   :  { %v566_v28 = vmul.f32 %v560_v23, %v560_v23  ;;  %v563_v29 = vadd.f32 %v562_v27, %v509_v21  ;;  %v1022_v30 = vpop.f32.mrb[19].mxu0 }
 0x829   :  { %v568_v31 = vmul.f32 %v566_v28, %v560_v23  ;;  %v567_v32 = vmul.f32 %v563_v29, %v563_v29 }
 0x82b   :  { %v570_v33 = vmul.f32 0.044715, %v568_v31  ;;  %v569_v34 = vmul.f32 %v567_v32, %v563_v29 }
 0x82d   :  { %v572_v35 = vadd.f32 %v570_v33, %v560_v23  ;;  %v571_v36 = vmul.f32 0.044715, %v569_v34 }
 0x82f   :  { %v574_v38 = vmul.f32 0.7978846, %v572_v35  ;;  %v573_v39 = vadd.f32 %v571_v36, %v563_v29 }
 0x831   :  { %1097 = vtanh.f32 %v574_v38  ;;  %v575_v41 = vmul.f32 0.7978846, %v573_v39 }
 0x833   :  { %1099 = vtanh.f32 %v575_v41 }
 0x83b   :  { %v1098_v42 = vpop.eup %1097 }
 0x83c   :  { %v578_v43 = vadd.f32 1.0, %v1098_v42  ;;  %v55_v42 = vld [vmem:[#allocation2 + $0x10] sm:$0xff] }
 0x83d   :  { %v1100_v44 = vpop.eup %1099 }
 0x83e   :  { %v580_v45 = vmul.f32 0.5, %v578_v43  ;;  %v579_v46 = vadd.f32 1.0, %v1100_v44  ;;  %v56_v43 = vld [vmem:[#allocation2 + $0x18] sm:$0xff] }
 0x840   :  { %v581_v0 = vmul.f32 0.5, %v579_v46  ;;  %v582_v47 = vmul.f32 %v580_v45, %v560_v23  ;;  %v733_v23 = vrot.slane %v1320_v26, %v732_v18 }
 0x842   :  { %v583_v48 = vmul.f32 %v581_v0, %v563_v29 }
 0x844   :  { %v584_v49 = vpack.c.bf16 %v583_v48, %v582_v47 }
 0x846   :  { %1040 = vmatmul.mubr.bf16.vlgmr.msra.gmra.mrb[8].mxu1 %v584_v49 }
 0x919   :  { %v683_v51 = vpop.f32.mrb[8].mxu1 }
 0x91a   :  { %v690_v52 = vadd.f32 %v683_v51, %v1375_v37  ;;  %v1041_v53 = vpop.f32.mrb[9].mxu1 }
 0x91b   :  { %v686_v54 = vpop.f32.mrb[10].mxu1 }
 0x91c   :  { %v691_v55 = vadd.f32 %v686_v54, %v1378_v40  ;;  %v1042_v56 = vpop.f32.mrb[11].mxu1  ;;  %v696_v57 = vadd.f32 %v695_v50, %v690_v52 }
 0x91e   :  { %v698_v58 = vsel %vm60_vm0, %v696_v57, 0.0  ;;  %v697_v59 = vadd.f32 %v695_v50, %v691_v55 }
 0x91f   :  { %699 = vadd.xlane.f32.xlu0 %v698_v58 }
 0x920   :  { %v701_v60 = vsel %vm60_vm0, %v697_v59, 0.0 }
 0x921   :  { %702 = vadd.xlane.f32.xlu1 %v701_v60 }
 0x9ac   :  { %v700_v61 = vpop.xlane.xlu0 %699 }
 0x9ad   :  { %v704_v62 = vmul.f32 0.03125, %v700_v61 }
 0x9ae   :  { %v703_v63 = vpop.xlane.xlu1 %702 }
 0x9af   :  { %v706_v2 = vsub.f32 %v696_v57, %v704_v62  ;;  %v705_v3 = vmul.f32 0.03125, %v703_v63 }
 0x9b1   :  { %v707_v4 = vsub.f32 %v697_v59, %v705_v3  ;;  %v708_v37 = vmul.f32 %v706_v2, %v706_v2 }
 0x9b3   :  { %v710_v5 = vsel %vm60_vm0, %v708_v37, 0.0  ;;  %v709_v6 = vmul.f32 %v707_v4, %v707_v4 }
 0x9b4   :  { %711 = vadd.xlane.f32.xlu0 %v710_v5 }
 0x9b5   :  { %v713_v40 = vsel %vm60_vm0, %v709_v6, 0.0 }
 0x9b6   :  { %714 = vadd.xlane.f32.xlu1 %v713_v40 }
 0xa41   :  { %v712_v9 = vpop.xlane.xlu0 %711 }
 0xa42   :  { %v716_v10 = vmul.f32 0.03125, %v712_v9 }
 0xa43   :  { %v715_v11 = vpop.xlane.xlu1 %714 }
 0xa44   :  { %v718_v12 = vadd.f32 1e-05, %v716_v10  ;;  %v717_v13 = vmul.f32 0.03125, %v715_v11 }
 0xa46   :  { %1101 = vrsqrt.f32 %v718_v12  ;;  %v719_v14 = vadd.f32 1e-05, %v717_v13 }
 0xa48   :  { %1103 = vrsqrt.f32 %v719_v14 }
 0xa50   :  { %v1102_v19 = vpop.eup %1101 }
 0xa51   :  { %v722_v20 = vmul.f32 %v1102_v19, %v706_v2 }
 0xa52   :  { %v1104_v21 = vpop.eup %1103 }
 0xa53   :  { %v728_v15 = vmul.f32 %v727_v17, %v722_v20  ;;  %v723_v22 = vmul.f32 %v1104_v21, %v707_v4 }
 0xa55   :  { %v729_v25 = vmul.f32 %v727_v17, %v723_v22  ;;  %v734_v27 = vadd.f32 %v733_v23, %v728_v15 }
 0xa57   :  { %v735_v28 = vadd.f32 %v733_v23, %v729_v25 }
 0xa59   :  { %v736_v29 = vpack.c.bf16 %v735_v28, %v734_v27 }
 0xa5b   :  { %1048 = vmatmul.mubr.msk.bf16.vlgmr.msra.gmra.mrb[20].mxu0 %vm60_vm0, %v736_v29 }
 0xb2e   :  { %v791_v30 = vpop.f32.mrb[20].mxu0 }
 0xb2f   :  { %798 = vst [vmem:[#allocation7] sm:$0xff] %v791_v30  ;;  %800 = vmax.xlane.f32.xlu0 %v791_v30  ;;  %v1049_v31 = vpop.f32.mrb[21].mxu0  ;;  %v820_v44 = vmul.f32 %v791_v30, %v55_v42 }
 0xb30   :  { %v794_v32 = vpop.f32.mrb[22].mxu0 }
 0xb31   :  { %799 = vst [vmem:[#allocation7 + $0x8] sm:$0xff] %v794_v32  ;;  %802 = vmax.xlane.f32.xlu1 %v794_v32  ;;  %v1050_v24 = vpop.f32.mrb[23].mxu0  ;;  %v821_v45 = vmul.f32 %v794_v32, %v56_v43 }
 0xbbc   :  { %v801_v33 = vpop.xlane.xlu0 %800 }
 0xbbd   :  { %v804_v34 = vsub.f32 %v791_v30, %v801_v33 }
 0xbbe   :  { %v803_v35 = vpop.xlane.xlu1 %802 }
 0xbbf   :  { %v806_v36 = vmul.f32 1.442695, %v804_v34  ;;  %v805_v38 = vsub.f32 %v794_v32, %v803_v35 }
 0xbc1   :  { %1105 = vpow2.f32 %v806_v36  ;;  %v808_v26 = vmul.f32 1.442695, %v805_v38 }
 0xbc3   :  { %1107 = vpow2.f32 %v808_v26 }
 0xbcb   :  { %v1106_v39 = vpop.eup %1105 }
 0xbcc   :  { %810 = vadd.xlane.f32.xlu0 %v1106_v39 }
 0xbcd   :  { %v1108_v41 = vpop.eup %1107 }
 0xbce   :  { %812 = vadd.xlane.f32.xlu1 %v1108_v41 }
 0xbd0   :  { %826 = vadd.xlane.f32.xlu0 %v55_v42 }
 0xbd2   :  { %828 = vadd.xlane.f32.xlu1 %v56_v43 }
 0xbd4   :  { %822 = vadd.xlane.f32.xlu0 %v820_v44 }
 0xbd6   :  { %824 = vadd.xlane.f32.xlu1 %v821_v45 }
 0xbd7   :  { %1172 = shalt.err (!%p1169_p6)
}
 0xbd8   :  { %s1173_s14 = scalar_lea.hbm %s1476_s5, 256 }
 0xbd9   :  { %p1174_p7 = scmp.ne.s32.totalorder %s1476_s5, %s1173_s14  ;;  %p1177_p8 = scmp.lt.u32.totalorder %s1173_s14, %s1476_s5 }
 0xbdb   :  { %p1179_p9 = pnand %p1177_p8, %p1174_p7 }
 0xbdd   :  { %1182 = shalt.err (!%p1179_p9)
}
 0xbde   :  { %879 = dma.vmem_to_hbm [thread:$0]  %s874_s10, 256, %s1476_s5, [#allocation4], %s1214_s7, %s1214_s7, %s1215_s8  }
 0xbdf   :  { %s1222_s5 = smov [#allocation8]  }
 0xbe0   :  { %s886_s7 = sshll.u32 %s1222_s5, 4  ;;  %s887_s7 = int_to_ptr.vmem [resolvable:$true] %s886_s7 }
 0xbe1   :  { %s1183_s8 = scalar_lea.vmem %s887_s7, 128  ;;  %p1188_p11 = scmp.lt.s32.totalorder %s887_s7, %s887_s7 }
 0xbe2   :  { %p1184_p10 = scmp.ne.s32.totalorder %s887_s7, %s1183_s8  ;;  %p1189_p12 = scmp.lt.s32.totalorder %s1183_s8, %s1183_s8 }
 0xbe4   :  { %p1190_p13 = por %p1189_p12, %p1188_p11 }
 0xbe6   :  { %p1191_p0 = pnand %p1190_p13, %p1184_p10 }
 0xc59   :  { %v811_v46 = vpop.xlane.xlu0 %810 }
 0xc5a   :  { %1109 = vlog2.f32 %v811_v46 }
 0xc5b   :  { %v813_v0 = vpop.xlane.xlu1 %812 }
 0xc5c   :  { %1111 = vlog2.f32 %v813_v0 }
 0xc5d   :  { %v827_v47 = vpop.xlane.xlu0 %826 }
 0xc5e   :  { %v840_v48 = vrot.slane %v827_v47, 4 }
 0xc5f   :  { %v829_v49 = vpop.xlane.xlu1 %828 }
 0xc60   :  { %v841_v1 = vadd.f32 %v840_v48, %v827_v47  ;;  %v855_v50 = vrot.slane %v829_v49, 4 }
 0xc61   :  { %v823_v37 = vpop.xlane.xlu0 %822 }
 0xc62   :  { %v842_v51 = vrot.slane %v841_v1, 2  ;;  %v856_v52 = vadd.f32 %v855_v50, %v829_v49 }
 0xc63   :  { %v825_v8 = vpop.xlane.xlu1 %824 }
 0xc64   :  { %v1110_v53 = vpop.eup %1109  ;;  %v843_v54 = vadd.f32 %v842_v51, %v841_v1  ;;  %v857_v55 = vrot.slane %v856_v52, 2 }
 0xc65   :  { %v815_v56 = vmul.f32 0.6931472, %v1110_v53 }
 0xc66   :  { %v1112_v57 = vpop.eup %1111  ;;  %v844_v58 = vrot.slane %v843_v54, 1  ;;  %v858_v59 = vadd.f32 %v857_v55, %v856_v52 }
 0xc67   :  { %v817_v60 = vmul.f32 0.6931472, %v1112_v57  ;;  %v818_v61 = vadd.f32 %v815_v56, %v801_v33 }
 0xc68   :  { %v845_v62 = vadd.f32 %v844_v58, %v843_v54  ;;  %v859_v63 = vrot.slane %v858_v59, 1 }
 0xc69   :  { %v830_v2 = vmul.f32 %v827_v47, %v818_v61  ;;  %v819_v3 = vadd.f32 %v817_v60, %v803_v35 }
 0xc6a   :  { %v860_v4 = vadd.f32 %v859_v63, %v858_v59  ;;  %v846_v5 = vmax.f32 %v845_v62, 1.0 }
 0xc6b   :  { %v832_v6 = vsub.f32 %v830_v2, %v823_v37  ;;  %v831_v40 = vmul.f32 %v829_v49, %v819_v3 }
 0xc6c   :  { %v861_v7 = vmax.f32 %v860_v4, 1.0  ;;  %1113 = vrcp.f32 %v846_v5 }
 0xc6d   :  { %v834_v9 = vrot.slane %v832_v6, 4  ;;  %v833_v10 = vsub.f32 %v831_v40, %v825_v8 }
 0xc6e   :  { %1115 = vrcp.f32 %v861_v7 }
 0xc6f   :  { %v835_v11 = vadd.f32 %v834_v9, %v832_v6  ;;  %v849_v12 = vrot.slane %v833_v10, 4 }
 0xc71   :  { %v836_v13 = vrot.slane %v835_v11, 2  ;;  %v850_v14 = vadd.f32 %v849_v12, %v833_v10 }
 0xc73   :  { %v837_v16 = vadd.f32 %v836_v13, %v835_v11  ;;  %v851_v17 = vrot.slane %v850_v14, 2 }
 0xc75   :  { %v838_v18 = vrot.slane %v837_v16, 1  ;;  %v852_v19 = vadd.f32 %v851_v17, %v850_v14 }
 0xc76   :  { %v1114_v15 = vpop.eup %1113 }
 0xc77   :  { %v839_v20 = vadd.f32 %v838_v18, %v837_v16  ;;  %v853_v21 = vrot.slane %v852_v19, 1 }
 0xc78   :  { %v1116_v23 = vpop.eup %1115 }
 0xc79   :  { %v854_v22 = vadd.f32 %v853_v21, %v852_v19  ;;  %v848_v25 = vmul.f32 %v1114_v15, %v839_v20 }
 0xc7b   :  { %v863_v27 = vmul.f32 %v1116_v23, %v854_v22 }
 0xc7d   :  { %v865_v28 = vadd.f32 %v863_v27, %v848_v25 }
 0xc7f   :  { %v866_v29 = vmul.f32 0.5, %v865_v28 }
 0xc81   :  { %867 = vst [vmem:[#allocation8] sm:$0xff] %v866_v29 }
 0xc82   :  { %1194 = shalt.err (!%p1191_p0)
}
 0xc83   :  { %s1195_s21 = scalar_lea.hbm %s1477_s6, 128 }
 0xc84   :  { %p1196_p1 = scmp.ne.s32.totalorder %s1477_s6, %s1195_s21  ;;  %p1199_p2 = scmp.lt.u32.totalorder %s1195_s21, %s1477_s6 }
 0xc86   :  { %p1201_p3 = pnand %p1199_p2, %p1196_p1 }
 0xc88   :  { %1204 = shalt.err (!%p1201_p3)
}
 0xc89   :  { %889 = dma.vmem_to_hbm [thread:$0]  %s887_s7, 128, %s1477_s6, [#allocation9]  }
 0xc8a   :  { %1209 = dma.done.wait [#allocation4], 256  }
 0xc8b   :  { %1210 = vsyncadd [#allocation4], 4294967040 }
 0xc8c   :  { %1211 = dma.done.wait [#allocation9], 128  }
 0xc8d   :  { %1212 = vsyncadd [#allocation9], 4294967168 }
 0xc8e   :  { %896 = vsyncpa [#allocation3], 1 }
 0xc8f   :  { %897 = vsyncpa [#allocation6], 1 }
 0xc90   :  { %898 = vsyncpa [#allocation4], 1 }
 0xc91   :  { %899 = vsyncpa [#allocation9], 1 }

</bundles_post_ra>
